<compile_context>
chip_gen: v6e
topology: v6e:2x2x1
jax: 0.10.0
libtpu: 0.0.40
codegen_flags: <defaults>
</compile_context>

<pallas_src>
import functools

import jax
import jax.numpy as jnp
from jax.experimental import pallas as pl
from jax.experimental.pallas import tpu as pltpu


def _round_up(x, m):
    return ((x + m - 1) // m) * m


def _mu_sigma_qz_kernel(x_ref, w_ref, shift_ref, out_ref, *, z_dim):
    # x_ref:     (tm, in_dim)   batch tile (f32 or bf16)
    # w_ref:     (in_dim, 2*z)  BN-folded W^T, grid-invariant
    # shift_ref: (1, 2*z)       b*scale + beta - mean*scale   (f32)
    # out_ref:   (tm, 2*z)      [:, :z] = tanh(bn)   [:, z:] = exp(tanh(bn))
    lin = jnp.dot(x_ref[...], w_ref[...], preferred_element_type=jnp.float32)
    lin = lin + shift_ref[...]
    t = jnp.tanh(lin)                                   # EUP
    col = jax.lax.broadcasted_iota(jnp.int32, t.shape, dimension=1)
    merged = jnp.where(col < z_dim, t, jnp.exp(t))      # exp on EUP, select on VPU
    out_ref[...] = merged.astype(out_ref.dtype)


def mu_sigma_qz_forward(group_input, w_t, b, bn_gamma, bn_beta, bn_mean, bn_var,
                        *, z_dim, eps=1e-5, tm=None, compute_dtype=None):
    """group_input: [B, dec_dim + c_dim]; w_t: [in_dim, 2*z_dim] (pre-transposed);
    b / bn_*: [2*z_dim].  Returns (mu, sigma), each [B, z_dim].

    compute_dtype: optionally jnp.bfloat16 to halve matmul-operand HBM traffic
    (recommended on v6e/v7x); accumulation and elementwise math remain f32.
    """
    B, in_dim = group_input.shape
    out2 = w_t.shape[1]
    assert out2 == 2 * z_dim

    # ---- batch tiling: big tiles amortize per-step overhead, but keep >= ~4 grid
    #      steps when B allows so the "parallel" axis feeds both v7x TensorCores. ----
    if tm is None:
        tm = min(1024, _round_up((B + 3) // 4, 8))
    tm = max(8, _round_up(int(tm), 8))
    B_pad = _round_up(B, tm)
    x_pad = group_input
    if B_pad != B:
        x_pad = jnp.pad(group_input, ((0, B_pad - B), (0, 0)))
    grid = (B_pad // tm,)

    # ---- fold eval-mode BN and the Linear bias into weights / shift ----
    f32 = jnp.float32
    scale = bn_gamma.astype(f32) / jnp.sqrt(bn_var.astype(f32) + eps)      # (out2,)
    w_fold = w_t.astype(f32) * scale[None, :]                              # (in_dim, out2)
    shift = (b.astype(f32) * scale + bn_beta.astype(f32)
             - bn_mean.astype(f32) * scale).reshape(1, out2)               # (1, out2)

    if compute_dtype is not None:
        x_pad = x_pad.astype(compute_dtype)
        w_fold = w_fold.astype(compute_dtype)

    out_dtype = group_input.dtype
    in_isz = jnp.dtype(x_pad.dtype).itemsize
    out_isz = jnp.dtype(out_dtype).itemsize

    # ---- explicit VMEM budget; cap at 48 MiB (headroom on v7x's 64 MiB/TC) ----
    est_bytes = (2 * tm * in_dim * in_isz            # x tile (double-buffered)
                 + in_dim * out2 * in_isz + out2 * 4  # resident W' + shift
                 + 2 * tm * out2 * out_isz)           # merged output (double-buffered)
    vmem_limit = int(min(max(2 * est_bytes, 4 << 20), 48 << 20))

    out_full = pl.pallas_call(
        functools.partial(_mu_sigma_qz_kernel, z_dim=z_dim),
        out_shape=jax.ShapeDtypeStruct((B_pad, out2), out_dtype),
        grid_spec=pltpu.PrefetchScalarGridSpec(
            num_scalar_prefetch=0,
            grid=grid,
            in_specs=[
                pl.BlockSpec((tm, in_dim), lambda i: (i, 0)),   # x batch tile
                pl.BlockSpec((in_dim, out2), lambda i: (0, 0)),  # folded W^T (resident)
                pl.BlockSpec((1, out2), lambda i: (0, 0)),       # folded shift
            ],
            out_specs=pl.BlockSpec((tm, out2), lambda i: (i, 0)),
        ),
        compiler_params=pltpu.CompilerParams(
            dimension_semantics=("parallel",),
            vmem_limit_bytes=vmem_limit,
        ),
    )(x_pad, w_fold, shift)

    # mu / sigma column split and padded-row removal in the wrapper (XLA slices).
    mu = out_full[:B, :z_dim]
    sigma = out_full[:B, z_dim:]
    return mu, sigma


def reference_forward(x, w_t, b, gamma, beta, mean, var, z_dim, eps=1e-5):
    lin = x @ w_t + b
    inv_std = 1.0 / jnp.sqrt(var + eps)
    out = jnp.tanh((lin - mean) * inv_std * gamma + beta)
    return out[:, :z_dim], jnp.exp(out[:, z_dim:])


def init_params(key, in_dim, z_dim, dtype=jnp.float32):
    """Deterministic init mimicking nn.Linear default + plausible BN running stats."""
    out2 = 2 * z_dim
    kw, kb, kg, kbe, km, kv = jax.random.split(key, 6)
    lim = 1.0 / float(in_dim) ** 0.5
    w_t = jax.random.uniform(kw, (in_dim, out2), dtype, -lim, lim)   # stored [in, out]
    b = jax.random.uniform(kb, (out2,), dtype, -lim, lim)
    bn_gamma = 1.0 + 0.1 * jax.random.normal(kg, (out2,), dtype)
    bn_beta = 0.1 * jax.random.normal(kbe, (out2,), dtype)
    bn_mean = 0.1 * jax.random.normal(km, (out2,), dtype)
    bn_var = jax.random.uniform(kv, (out2,), dtype, 0.5, 1.5)
    return w_t, b, bn_gamma, bn_beta, bn_mean, bn_var


if __name__ == "__main__":
    # Shapes consistent with the module: batch=8, dec_dim=24, c_dim=8, z_dim=16
    #   -> input_dim = 32, output = 2*z_dim = 32
    batch, dec_dim, c_dim, z_dim = 8, 24, 8, 16
    in_dim = dec_dim + c_dim

    key = jax.random.PRNGKey(0)
    k_x, k_p, k_x2 = jax.random.split(key, 3)
    group_input = jax.random.normal(k_x, (batch, in_dim), jnp.float32)
    params = init_params(k_p, in_dim, z_dim)
    w_t, b, bn_gamma, bn_beta, bn_mean, bn_var = params

    # --- default f32 path (exact PyTorch eval-mode numerics) ---
    mu, sigma = mu_sigma_qz_forward(group_input, *params, z_dim=z_dim)
    jax.block_until_ready((mu, sigma))

    mu_r, sigma_r = reference_forward(group_input, *params, z_dim)
    assert mu.shape == (batch, z_dim) and sigma.shape == (batch, z_dim)
    assert jnp.allclose(mu, mu_r, atol=1e-5, rtol=1e-5)
    assert jnp.allclose(sigma, sigma_r, atol=1e-5, rtol=1e-5)

    # --- multi-tile path: non-divisible batch exercises padding + parallel grid ---
    batch2 = 50
    x2 = jax.random.normal(k_x2, (batch2, in_dim), jnp.float32)
    mu2, sigma2 = mu_sigma_qz_forward(x2, *params, z_dim=z_dim)
    jax.block_until_ready((mu2, sigma2))
    mu2_r, sigma2_r = reference_forward(x2, *params, z_dim)
    assert mu2.shape == (batch2, z_dim) and sigma2.shape == (batch2, z_dim)
    assert jnp.allclose(mu2, mu2_r, atol=1e-5, rtol=1e-5)
    assert jnp.allclose(sigma2, sigma2_r, atol=1e-5, rtol=1e-5)

    # --- bf16 matmul-operand path (v6e/v7x byte-reduction option), f32 math/accum ---
    mu_b, sigma_b = mu_sigma_qz_forward(
        x2, *params, z_dim=z_dim, compute_dtype=jnp.bfloat16
    )
    jax.block_until_ready((mu_b, sigma_b))
    assert jnp.allclose(mu_b, mu2_r, atol=5e-2, rtol=5e-2)
    assert jnp.allclose(sigma_b, sigma2_r, atol=5e-2, rtol=5e-2)

    print("KERNEL_OK")
</pallas_src>

<mosaic_0001>
module attributes {stable_mosaic.version = 11 : i64} {
  func.func @_mu_sigma_qz_kernel(%arg0: i32, %arg1: memref<8x32xf32, #tpu.memory_space<vmem>>, %arg2: memref<32x32xf32, #tpu.memory_space<vmem>>, %arg3: memref<1x32xf32, #tpu.memory_space<vmem>>, %arg4: memref<8x32xf32, #tpu.memory_space<vmem>>) attributes {dimension_semantics = [#tpu.dimension_semantics<parallel>], iteration_bounds = array<i64: 1>, scalar_prefetch = 0 : i64, scratch_operands = 0 : i64, tpu.core_type = #tpu.core_type<tc>, window_params = [{transform_indices = @transform_0, window_bounds = array<i64: 8, 32>}, {pipeline_mode = #tpu.pipeline_mode<synchronous>, transform_indices = @transform_1, window_bounds = array<i64: 32, 32>}, {pipeline_mode = #tpu.pipeline_mode<synchronous>, transform_indices = @transform_2, window_bounds = array<i64: 1, 32>}, {transform_indices = @transform_3, window_bounds = array<i64: 8, 32>}]} {
    %c0 = arith.constant 0 : index
    %c0_0 = arith.constant 0 : index
    %0 = vector.load %arg1[%c0, %c0_0] : memref<8x32xf32, #tpu.memory_space<vmem>>, vector<8x32xf32>
    %c0_1 = arith.constant 0 : index
    %c0_2 = arith.constant 0 : index
    %1 = vector.load %arg2[%c0_1, %c0_2] : memref<32x32xf32, #tpu.memory_space<vmem>>, vector<32x32xf32>
    %cst = arith.constant dense<0.000000e+00> : vector<8x32xf32>
    %2 = tpu.matmul %0, %1, %cst {dimension_numbers = #tpu.dot_dimension_numbers<[1], [0], [0], [1], [0, 0, 1, 1], [], []>} : vector<8x32xf32>, vector<32x32xf32>, vector<8x32xf32> -> vector<8x32xf32>
    %c0_3 = arith.constant 0 : index
    %c0_4 = arith.constant 0 : index
    %3 = vector.load %arg3[%c0_3, %c0_4] : memref<1x32xf32, #tpu.memory_space<vmem>>, vector<1x32xf32>
    %4 = vector.broadcast %3 : vector<1x32xf32> to vector<8x32xf32>
    %5 = arith.addf %2, %4 : vector<8x32xf32>
    %6 = math.tanh %5 : vector<8x32xf32>
    %7 = tpu.iota {dimensions = array<i32: 1>} : vector<8x32xi32>
    %c16_i32 = arith.constant 16 : i32
    %8 = vector.broadcast %c16_i32 : i32 to vector<8x32xi32>
    %9 = arith.cmpi slt, %7, %8 : vector<8x32xi32>
    %10 = math.exp %6 : vector<8x32xf32>
    %11 = arith.select %9, %6, %10 : vector<8x32xi1>, vector<8x32xf32>
    %c0_5 = arith.constant 0 : index
    %c0_6 = arith.constant 0 : index
    %12 = vector.load %arg4[%c0_5, %c0_6] : memref<8x32xf32, #tpu.memory_space<vmem>>, vector<8x32xf32>
    tpu.vector_store %arg4[%c0_5, %c0_6], %11 {strides = array<i32>} : memref<8x32xf32, #tpu.memory_space<vmem>>, vector<8x32xf32>,
    return
  }
  func.func @transform_0(%arg0: i32) -> (i32, i32) {
    %c0_i32 = arith.constant 0 : i32
    %c0_i32_0 = arith.constant 0 : i32
    return %arg0, %c0_i32 : i32, i32
  }
  func.func @transform_1(%arg0: i32) -> (i32, i32) {
    %c0_i32 = arith.constant 0 : i32
    %c0_i32_0 = arith.constant 0 : i32
    %c0_i32_1 = arith.constant 0 : i32
    return %c0_i32, %c0_i32_0 : i32, i32
  }
  func.func @transform_2(%arg0: i32) -> (i32, i32) {
    %c0_i32 = arith.constant 0 : i32
    %c0_i32_0 = arith.constant 0 : i32
    %c0_i32_1 = arith.constant 0 : i32
    return %c0_i32, %c0_i32_0 : i32, i32
  }
  func.func @transform_3(%arg0: i32) -> (i32, i32) {
    %c0_i32 = arith.constant 0 : i32
    %c0_i32_0 = arith.constant 0 : i32
    return %arg0, %c0_i32 : i32, i32
  }
}

</mosaic_0001>

<bundles_post_ra>
// kernel: tpu_custom_call.1
= control target key start
LH: loop header
LB: loop body
LE: loop exit
PB: predicated region body
PF: predicated region fallthrough
CT: control target
= control target key end

     0   :  { %8 = vsyncpa [#allocation3], 0  ;;  %s287_s0 = inlined_call_operand.hbm [shape: f32[8,32], index: 0, kind: input, shape index: {}]   ;;  %s288_s1 = inlined_call_operand.hbm [shape: f32[32,32], index: 1, kind: input, shape index: {}]   ;;  %s289_s2 = inlined_call_operand.vmem [shape: f32[1,32], index: 2, kind: input, shape index: {}]   ;;  %s290_s3 = inlined_call_operand.hbm [shape: f32[8,32], index: 3, kind: output, shape index: {}]  }
   0x1   :  { %9 = vsyncpa [#allocation6], 0 }
   0x2   :  { %10 = vsyncpa [#allocation4], 0  ;;  %s246_s12 = smov [#allocation2]   ;;  %s247_s14 = smov [#allocation5]  }
   0x3   :  { %s17_s13 = sshll.u32 %s246_s12, 4  ;;  %s26_s15 = sshll.u32 %s247_s14, 4  ;;  %s18_s13 = int_to_ptr.vmem [resolvable:$true] %s17_s13  ;;  %s27_s15 = int_to_ptr.vmem [resolvable:$true] %s26_s15 }
   0x4   :  { %s188_s16 = scalar_lea.vmem %s18_s13, 128  ;;  %p193_p1 = scmp.lt.s32.totalorder %s18_s13, %s18_s13 }
   0x5   :  { %p189_p0 = scmp.ne.s32.totalorder %s18_s13, %s188_s16  ;;  %p194_p2 = scmp.lt.s32.totalorder %s188_s16, %s188_s16 }
   0x7   :  { %p195_p3 = por %p194_p2, %p193_p1 }
   0x9   :  { %p196_p4 = pnand %p195_p3, %p189_p0 }
   0xb   :  { %199 = shalt.err (!%p196_p4)
}
   0xc   :  { %20 = dma.hbm_to_vmem [thread:$0]  %s287_s0, 128, %s18_s13, [#allocation3]  }
   0xd   :  { %s208_s19 = scalar_lea.vmem %s27_s15, 512  ;;  %p213_p6 = scmp.lt.s32.totalorder %s27_s15, %s27_s15 }
   0xe   :  { %p209_p5 = scmp.ne.s32.totalorder %s27_s15, %s208_s19  ;;  %p214_p7 = scmp.lt.s32.totalorder %s208_s19, %s208_s19 }
  0x10   :  { %p215_p8 = por %p214_p7, %p213_p6 }
  0x12   :  { %p216_p9 = pnand %p215_p8, %p209_p5 }
  0x14   :  { %219 = shalt.err (!%p216_p9)
}
  0x15   :  { %s248_s20 = smov 128   ;;  %s249_s21 = smov 8  }
  0x16   :  { %32 = dma.hbm_to_vmem [thread:$0]  %s288_s1, 512, %s27_s15, [#allocation6], %s248_s20, %s248_s20, %s249_s21  }
  0x17   :  { %240 = dma.done.wait [#allocation3], 128  }
  0x18   :  { %241 = vsyncadd [#allocation3], 4294967168 }
  0x19   :  { %242 = dma.done.wait [#allocation6], 512  }
  0x1a   :  { %243 = vsyncadd [#allocation6], 4294966784  ;;  %v250_v0 = vmov 0.0   ;;  %vm251_vm0 = vmmov 0   ;;  %v45_v1 = vld [vmem:[#allocation5 + $0x18] sm:$0xff]  ;;  %v44_v2 = vld [vmem:[#allocation5 + $0x10] sm:$0xff]  ;;  %v128_v12 = vlaneseq }
  0x1b   :  { %158 = vmatprep.subr.mxu0 %v250_v0  ;;  %166 = vmatprep.mubr.msk.f32.mxu0 %vm251_vm0, %v250_v0  ;;  %v43_v3 = vld [vmem:[#allocation5 + $0x8] sm:$0xff]  ;;  %v42_v4 = vld [vmem:[#allocation5] sm:$0xff]  ;;  %v41_v5 = vld [vmem:[#allocation2] sm:$0xff]  ;;  %vm53_vm1 = vcmask 261120   ;;  %s252_s24 = smov [#allocation7]  }
  0x1c   :  { %159 = vmatpush3.msra.mxu0 %v45_v1  ;;  %v151_v6 = vld [vmem:[%s289_s2] ss:$0 sm:$0xff]  ;;  %v129_v13 = vand.u32 127, %v128_v12  ;;  %s141_s25 = sshll.u32 %s252_s24, 4  ;;  %s142_s25 = int_to_ptr.vmem [resolvable:$true] %s141_s25 }
  0x1d   :  { %160 = vmatprep.subr.mxu0 %v250_v0  ;;  %s220_s26 = scalar_lea.vmem %s142_s25, 128  ;;  %p225_p11 = scmp.lt.s32.totalorder %s142_s25, %s142_s25 }
  0x1e   :  { %161 = vmatpush3.msra.mxu0 %v44_v2  ;;  %vm130_vm2 = vcmp.lt.s32.totalorder %v129_v13, 16  ;;  %p221_p10 = scmp.ne.s32.totalorder %s142_s25, %s220_s26  ;;  %p226_p12 = scmp.lt.s32.totalorder %s220_s26, %s220_s26 }
  0x1f   :  { %162 = vmatprep.subr.mxu0 %v250_v0 }
  0x20   :  { %163 = vmatpush3.msra.mxu0 %v43_v3  ;;  %p227_p13 = por %p226_p12, %p225_p11 }
  0x21   :  { %164 = vmatprep.subr.mxu0 %v250_v0 }
  0x22   :  { %165 = vmatpush3.msra.mxu0 %v42_v4  ;;  %p228_p0 = pnand %p227_p13, %p221_p10 }
  0x23   :  { %167 = vmatmul.mubr.msk.f32.vlgmr.msra.gmra.mxu0 %vm53_vm1, %v41_v5 }
  0xe3   :  { %v123_v7 = vpop.f32.mrf.mxu0 }
  0xe4   :  { %v124_v8 = vadd.f32 %v151_v6, %v123_v7 }
  0xe5   :  { %v168_v9 = vpop.f32.mrf.mxu0 }
  0xe6   :  { %176 = vtanh.f32 %v124_v8 }
  0xf3   :  { %v177_v10 = vpop.eup %176 }
  0xf4   :  { %v131_v11 = vmul.f32 1.442695, %v177_v10 }
  0xf6   :  { %178 = vpow2.f32 %v131_v11 }
 0x103   :  { %v179_v14 = vpop.eup %178 }
 0x104   :  { %v133_v15 = vsel %vm130_vm2, %v177_v10, %v179_v14 }
 0x105   :  { %134 = vst.msk [vmem:[#allocation7] sm:$0xff] %vm53_vm1, %v133_v15 }
 0x106   :  { %231 = shalt.err (!%p228_p0)
}
 0x107   :  { %144 = dma.vmem_to_hbm [thread:$0]  %s142_s25, 128, %s290_s3, [#allocation4]  }
 0x108   :  { %244 = dma.done.wait [#allocation4], 128  }
 0x109   :  { %245 = vsyncadd [#allocation4], 4294967168 }
 0x10a   :  { %148 = vsyncpa [#allocation3], 1 }
 0x10b   :  { %149 = vsyncpa [#allocation6], 1 }
 0x10c   :  { %150 = vsyncpa [#allocation4], 1 }

</bundles_post_ra>
